<compile_context>
chip_gen: v6e
topology: v6e:2x2x1
jax: 0.10.0
libtpu: 0.0.40
codegen_flags: <defaults>
</compile_context>

<pallas_src>
import jax
import jax.numpy as jnp
from jax import lax
from jax.experimental import pallas as pl
from jax.experimental.pallas import tpu as pltpu

LANE = 128
SUBLANE = 8


def _round_up(x, m):
    return (x + m - 1) // m * m


# ---------------------------------------------------------------------------
# Kernels
# ---------------------------------------------------------------------------

def _compute_q(x_ref, w1_ref, b1_ref, w2_ref, b2_ref):
    """Shared body: returns the (TB, A) f32 q-value tile."""
    # fc1: in-kernel bf16 cast of x, bf16 MXU operands, f32 accumulation,
    # f32 bias + ReLU epilogue. Hidden dim is lane-padded to 128 with zeros
    # (pad columns stay exactly zero through ReLU, contribute nothing to fc2).
    xb = x_ref[...].astype(jnp.bfloat16)
    h = jnp.dot(xb, w1_ref[...], preferred_element_type=jnp.float32)
    h = jnp.maximum(h + b1_ref[...], 0.0)
    # fc2 on the lane-padded (Hp, Ap) weight (full 128x128 MXU tile); only the
    # first A columns are real -> slice before the narrow store.
    qp = jnp.dot(h.astype(jnp.bfloat16), w2_ref[...],
                 preferred_element_type=jnp.float32)
    a = b2_ref.shape[1]
    return qp[:, :a] + b2_ref[...]


def qnetwork_q_kernel(x_ref, w1_ref, b1_ref, w2_ref, b2_ref, out_ref):
    out_ref[...] = _compute_q(x_ref, w1_ref, b1_ref, w2_ref, b2_ref)


def qnetwork_action_kernel(x_ref, w1_ref, b1_ref, w2_ref, b2_ref, act_ref):
    # NOTE: argmax is per-row, so batch-padding rows produce garbage actions
    # that the wrapper slices off; no cross-batch reduction happens here.
    q = _compute_q(x_ref, w1_ref, b1_ref, w2_ref, b2_ref)
    a = q.shape[1]
    ids = lax.broadcasted_iota(jnp.int32, q.shape, 1)
    q_max = jnp.max(q, axis=-1, keepdims=True)
    # First index attaining the max (same tie-break as torch.argmax).
    act = jnp.min(jnp.where(q == q_max, ids, a), axis=-1, keepdims=True)
    act_ref[...] = act.astype(jnp.int32)


# ---------------------------------------------------------------------------
# Wrappers
# ---------------------------------------------------------------------------

def prepare_qnetwork_params(w1, b1, w2, b2):
    """Pad / cast weights once per weight update (hoisted out of the forward).

    w1: [S, H], b1: [H], w2: [H, A], b2: [A]  (f32, [in, out] layout).
    """
    S, H = w1.shape
    A = w2.shape[1]
    Hp = _round_up(H, LANE)
    Ap = _round_up(A, LANE)
    w1p = jnp.pad(w1.astype(jnp.bfloat16), ((0, 0), (0, Hp - H)))
    b1p = jnp.pad(b1.astype(jnp.float32).reshape(1, H), ((0, 0), (0, Hp - H)))
    w2p = jnp.pad(w2.astype(jnp.bfloat16), ((0, Hp - H), (0, Ap - A)))
    b2r = b2.astype(jnp.float32).reshape(1, A)
    return w1p, b1p, w2p, b2r


def _batch_tiles(B, block_b):
    """Pick (n_tiles, TB, Bp): tiles evenly cover B (<8 padded rows per tile)
    and there are >= 2 tiles for moderate batches so v7x's second TensorCore
    isn't idle under dimension_semantics=('parallel',)."""
    n_tiles = pl.cdiv(B, block_b)
    if n_tiles < 2 and B >= 2 * SUBLANE:
        n_tiles = 2
    TB = _round_up(pl.cdiv(B, n_tiles), SUBLANE)
    Bp = n_tiles * TB
    return n_tiles, TB, Bp


def _run(kernel, out_dtype, out_cols, x, params, block_b):
    w1p, b1p, w2p, b2r = params
    B, S = x.shape
    Hp = w1p.shape[1]
    Ap = w2p.shape[1]
    A = b2r.shape[1]

    n_tiles, TB, Bp = _batch_tiles(B, block_b)
    xp = jnp.pad(x, ((0, Bp - B), (0, 0))) if Bp != B else x

    out = pl.pallas_call(
        kernel,
        out_shape=jax.ShapeDtypeStruct((Bp, out_cols), out_dtype),
        grid_spec=pltpu.PrefetchScalarGridSpec(
            num_scalar_prefetch=0,
            grid=(n_tiles,),
            in_specs=[
                pl.BlockSpec((TB, S), lambda i: (i, 0)),    # x tile (pipelined, f32)
                pl.BlockSpec((S, Hp), lambda i: (0, 0)),    # w1 (VMEM-resident)
                pl.BlockSpec((1, Hp), lambda i: (0, 0)),    # b1 (resident)
                pl.BlockSpec((Hp, Ap), lambda i: (0, 0)),   # w2 (resident)
                pl.BlockSpec((1, A), lambda i: (0, 0)),     # b2 (resident, unpadded)
            ],
            out_specs=pl.BlockSpec((TB, out_cols), lambda i: (i, 0)),
        ),
        compiler_params=pltpu.CompilerParams(
            dimension_semantics=("parallel",),
            vmem_limit_bytes=32 * 1024 * 1024,
        ),
    )(xp, w1p, b1p, w2p, b2r)
    return out[:B]


def qnetwork_forward(x, params, *, block_b=8192):
    """x: [B, state_size] f32; params from prepare_qnetwork_params.
    Returns q-values [B, action_size] f32 (forward pass of the PyTorch
    QNetwork; bf16 MXU operands / f32 accumulation, ~1e-2 rel. vs pure f32)."""
    A = params[3].shape[1]
    return _run(qnetwork_q_kernel, jnp.float32, A, x, params, block_b)


def qnetwork_greedy_action(x, params, *, block_b=8192):
    """Fused greedy policy: argmax_a Q(s, a) -> [B] int32, without writing the
    q-values back to HBM."""
    return _run(qnetwork_action_kernel, jnp.int32, 1, x, params, block_b)[:, 0]


def init_qnetwork_params(key, state_size, action_size, hidden=64,
                         dtype=jnp.float32):
    """nn.Linear-style init: U(-1/sqrt(fan_in), +1/sqrt(fan_in)).
    Weights are [in, out] (transposed vs PyTorch) so the kernel does x @ W."""
    k1, k2, k3, k4 = jax.random.split(key, 4)
    bound1 = 1.0 / jnp.sqrt(state_size)
    bound2 = 1.0 / jnp.sqrt(hidden)
    w1 = jax.random.uniform(k1, (state_size, hidden), dtype, -bound1, bound1)
    b1 = jax.random.uniform(k2, (hidden,), dtype, -bound1, bound1)
    w2 = jax.random.uniform(k3, (hidden, action_size), dtype, -bound2, bound2)
    b2 = jax.random.uniform(k4, (action_size,), dtype, -bound2, bound2)
    return w1, b1, w2, b2


if __name__ == "__main__":
    batch, state_size, action_size = 2, 8, 4

    key = jax.random.PRNGKey(0)
    k_params, k_x, k_x2 = jax.random.split(key, 3)

    w1, b1, w2, b2 = init_qnetwork_params(k_params, state_size, action_size)
    params = prepare_qnetwork_params(w1, b1, w2, b2)   # hoisted: once per update

    def ref_f32(xx):
        return jnp.maximum(xx @ w1 + b1, 0.0) @ w2 + b2

    def ref_bf16(xx):
        h = jnp.maximum(
            jnp.dot(xx.astype(jnp.bfloat16), w1.astype(jnp.bfloat16),
                    preferred_element_type=jnp.float32) + b1, 0.0)
        return jnp.dot(h.astype(jnp.bfloat16), w2.astype(jnp.bfloat16),
                       preferred_element_type=jnp.float32) + b2

    # Small batch (single 8-row tile).
    x = jax.random.normal(k_x, (batch, state_size), dtype=jnp.float32)
    q = jax.block_until_ready(qnetwork_forward(x, params))
    assert q.shape == (batch, action_size)
    assert jnp.allclose(q, ref_bf16(x), atol=1e-4, rtol=1e-4)
    assert jnp.allclose(q, ref_f32(x), atol=5e-2, rtol=5e-2)

    # Awkward batch -> 2 tiles with padded tail rows (multi-tile / megacore path).
    x2 = jax.random.normal(k_x2, (37, state_size), dtype=jnp.float32)
    q2 = jax.block_until_ready(qnetwork_forward(x2, params))
    assert q2.shape == (37, action_size)
    assert jnp.allclose(q2, ref_bf16(x2), atol=1e-4, rtol=1e-4)

    # Fused greedy-action kernel matches argmax over the kernel q-values.
    a2 = jax.block_until_ready(qnetwork_greedy_action(x2, params))
    assert a2.shape == (37,)
    assert jnp.array_equal(a2, jnp.argmax(q2, axis=-1).astype(jnp.int32))

    print("KERNEL_OK")
</pallas_src>

<mosaic_0001>
module attributes {stable_mosaic.version = 11 : i64} {
  func.func @qnetwork_q_kernel(%arg0: i32, %arg1: memref<8x8xf32, #tpu.memory_space<vmem>>, %arg2: memref<8x128xbf16, #tpu.memory_space<vmem>>, %arg3: memref<1x128xf32, #tpu.memory_space<vmem>>, %arg4: memref<128x128xbf16, #tpu.memory_space<vmem>>, %arg5: memref<1x4xf32, #tpu.memory_space<vmem>>, %arg6: memref<8x4xf32, #tpu.memory_space<vmem>>) attributes {dimension_semantics = [#tpu.dimension_semantics<parallel>], iteration_bounds = array<i64: 1>, scalar_prefetch = 0 : i64, scratch_operands = 0 : i64, tpu.core_type = #tpu.core_type<tc>, window_params = [{transform_indices = @transform_0, window_bounds = array<i64: 8, 8>}, {pipeline_mode = #tpu.pipeline_mode<synchronous>, transform_indices = @transform_1, window_bounds = array<i64: 8, 128>}, {pipeline_mode = #tpu.pipeline_mode<synchronous>, transform_indices = @transform_2, window_bounds = array<i64: 1, 128>}, {pipeline_mode = #tpu.pipeline_mode<synchronous>, transform_indices = @transform_3, window_bounds = array<i64: 128, 128>}, {pipeline_mode = #tpu.pipeline_mode<synchronous>, transform_indices = @transform_4, window_bounds = array<i64: 1, 4>}, {transform_indices = @transform_5, window_bounds = array<i64: 8, 4>}]} {
    %c0 = arith.constant 0 : index
    %c0_0 = arith.constant 0 : index
    %0 = vector.load %arg1[%c0, %c0_0] : memref<8x8xf32, #tpu.memory_space<vmem>>, vector<8x8xf32>
    %1 = arith.truncf %0 : vector<8x8xf32> to vector<8x8xbf16>
    %c0_1 = arith.constant 0 : index
    %c0_2 = arith.constant 0 : index
    %2 = vector.load %arg2[%c0_1, %c0_2] : memref<8x128xbf16, #tpu.memory_space<vmem>>, vector<8x128xbf16>
    %cst = arith.constant dense<0.000000e+00> : vector<8x128xf32>
    %3 = tpu.matmul %1, %2, %cst {dimension_numbers = #tpu.dot_dimension_numbers<[1], [0], [0], [1], [0, 0, 1, 1], [], []>} : vector<8x8xbf16>, vector<8x128xbf16>, vector<8x128xf32> -> vector<8x128xf32>
    %c0_3 = arith.constant 0 : index
    %c0_4 = arith.constant 0 : index
    %4 = vector.load %arg3[%c0_3, %c0_4] : memref<1x128xf32, #tpu.memory_space<vmem>>, vector<1x128xf32>
    %5 = vector.broadcast %4 : vector<1x128xf32> to vector<8x128xf32>
    %6 = arith.addf %3, %5 : vector<8x128xf32>
    %cst_5 = arith.constant 0.000000e+00 : f32
    %7 = vector.broadcast %cst_5 : f32 to vector<8x128xf32>
    %8 = arith.maximumf %6, %7 : vector<8x128xf32>
    %9 = arith.truncf %8 : vector<8x128xf32> to vector<8x128xbf16>
    %c0_6 = arith.constant 0 : index
    %c0_7 = arith.constant 0 : index
    %10 = vector.load %arg4[%c0_6, %c0_7] : memref<128x128xbf16, #tpu.memory_space<vmem>>, vector<128x128xbf16>
    %cst_8 = arith.constant dense<0.000000e+00> : vector<8x128xf32>
    %11 = tpu.matmul %9, %10, %cst_8 {dimension_numbers = #tpu.dot_dimension_numbers<[1], [0], [0], [1], [0, 0, 1, 1], [], []>} : vector<8x128xbf16>, vector<128x128xbf16>, vector<8x128xf32> -> vector<8x128xf32>
    %12 = vector.extract_strided_slice %11 {offsets = [0, 0], sizes = [8, 4], strides = [1, 1]} : vector<8x128xf32> to vector<8x4xf32>
    %c0_9 = arith.constant 0 : index
    %c0_10 = arith.constant 0 : index
    %13 = vector.load %arg5[%c0_9, %c0_10] : memref<1x4xf32, #tpu.memory_space<vmem>>, vector<1x4xf32>
    %14 = vector.broadcast %13 : vector<1x4xf32> to vector<8x4xf32>
    %15 = arith.addf %12, %14 : vector<8x4xf32>
    %c0_11 = arith.constant 0 : index
    %c0_12 = arith.constant 0 : index
    %16 = vector.load %arg6[%c0_11, %c0_12] : memref<8x4xf32, #tpu.memory_space<vmem>>, vector<8x4xf32>
    tpu.vector_store %arg6[%c0_11, %c0_12], %15 {strides = array<i32>} : memref<8x4xf32, #tpu.memory_space<vmem>>, vector<8x4xf32>,
    return
  }
  func.func @transform_0(%arg0: i32) -> (i32, i32) {
    %c0_i32 = arith.constant 0 : i32
    %c0_i32_0 = arith.constant 0 : i32
    return %arg0, %c0_i32 : i32, i32
  }
  func.func @transform_1(%arg0: i32) -> (i32, i32) {
    %c0_i32 = arith.constant 0 : i32
    %c0_i32_0 = arith.constant 0 : i32
    %c0_i32_1 = arith.constant 0 : i32
    return %c0_i32, %c0_i32_0 : i32, i32
  }
  func.func @transform_2(%arg0: i32) -> (i32, i32) {
    %c0_i32 = arith.constant 0 : i32
    %c0_i32_0 = arith.constant 0 : i32
    %c0_i32_1 = arith.constant 0 : i32
    return %c0_i32, %c0_i32_0 : i32, i32
  }
  func.func @transform_3(%arg0: i32) -> (i32, i32) {
    %c0_i32 = arith.constant 0 : i32
    %c0_i32_0 = arith.constant 0 : i32
    %c0_i32_1 = arith.constant 0 : i32
    return %c0_i32, %c0_i32_0 : i32, i32
  }
  func.func @transform_4(%arg0: i32) -> (i32, i32) {
    %c0_i32 = arith.constant 0 : i32
    %c0_i32_0 = arith.constant 0 : i32
    %c0_i32_1 = arith.constant 0 : i32
    return %c0_i32, %c0_i32_0 : i32, i32
  }
  func.func @transform_5(%arg0: i32) -> (i32, i32) {
    %c0_i32 = arith.constant 0 : i32
    %c0_i32_0 = arith.constant 0 : i32
    return %arg0, %c0_i32 : i32, i32
  }
}

</mosaic_0001>

<bundles_post_ra>
// kernel: tpu_custom_call.1
= control target key start
LH: loop header
LB: loop body
LE: loop exit
PB: predicated region body
PF: predicated region fallthrough
CT: control target
= control target key end

     0   :  { %10 = vsyncpa [#allocation3], 0  ;;  %s420_s0 = inlined_call_operand.hbm [shape: f32[8,8], index: 0, kind: input, shape index: {}]   ;;  %s421_s1 = inlined_call_operand.hbm [shape: bf16[8,128], index: 1, kind: input, shape index: {}]   ;;  %s422_s2 = inlined_call_operand.vmem [shape: f32[1,128], index: 2, kind: input, shape index: {}]   ;;  %s423_s3 = inlined_call_operand.hbm [shape: bf16[128,128], index: 3, kind: input, shape index: {}]   ;;  %s424_s4 = inlined_call_operand.vmem [shape: f32[1,4], index: 4, kind: input, shape index: {}]   ;;  %s425_s5 = inlined_call_operand.vmem [shape: f32[8,4], index: 5, kind: output, shape index: {}]  }
   0x1   :  { %11 = vsyncpa [#allocation5], 0  ;;  %s365_s18 = smov [#allocation4]   ;;  %s366_s20 = smov [#allocation2]  }
   0x2   :  { %s28_s19 = sshll.u32 %s365_s18, 4  ;;  %s18_s21 = sshll.u32 %s366_s20, 4  ;;  %s29_s19 = int_to_ptr.vmem [resolvable:$true] %s28_s19  ;;  %s19_s21 = int_to_ptr.vmem [resolvable:$true] %s18_s21 }
   0x3   :  { %s309_s22 = scalar_lea.vmem %s29_s19, 64  ;;  %p314_p1 = scmp.lt.s32.totalorder %s29_s19, %s29_s19 }
   0x4   :  { %p310_p0 = scmp.ne.s32.totalorder %s29_s19, %s309_s22  ;;  %p315_p2 = scmp.lt.s32.totalorder %s309_s22, %s309_s22 }
   0x6   :  { %p316_p3 = por %p315_p2, %p314_p1 }
   0x8   :  { %p317_p4 = pnand %p316_p3, %p310_p0 }
   0xa   :  { %320 = shalt.err (!%p317_p4)
}
   0xb   :  { %31 = dma.hbm_to_vmem [thread:$0]  %s421_s1, 64, %s29_s19, [#allocation5]  }
   0xc   :  { %s329_s25 = scalar_lea.vmem %s19_s21, 128  ;;  %p334_p6 = scmp.lt.s32.totalorder %s19_s21, %s19_s21 }
   0xd   :  { %p330_p5 = scmp.ne.s32.totalorder %s19_s21, %s329_s25  ;;  %p335_p7 = scmp.lt.s32.totalorder %s329_s25, %s329_s25 }
   0xf   :  { %p336_p8 = por %p335_p7, %p334_p6 }
  0x11   :  { %p337_p9 = pnand %p336_p8, %p330_p5 }
  0x13   :  { %340 = shalt.err (!%p337_p9)
}
  0x14   :  { %21 = dma.hbm_to_vmem [thread:$0]  %s420_s0, 128, %s19_s21, [#allocation3]  }
  0x15   :  { %s367_s28 = smov [#allocation6]  }
  0x16   :  { %s39_s29 = sshll.u32 %s367_s28, 4  ;;  %s40_s29 = int_to_ptr.vmem [resolvable:$true] %s39_s29 }
  0x17   :  { %s349_s30 = scalar_lea.vmem %s40_s29, 1024  ;;  %p354_p11 = scmp.lt.s32.totalorder %s40_s29, %s40_s29 }
  0x18   :  { %p350_p10 = scmp.ne.s32.totalorder %s40_s29, %s349_s30  ;;  %p355_p12 = scmp.lt.s32.totalorder %s349_s30, %s349_s30 }
  0x1a   :  { %p356_p13 = por %p355_p12, %p354_p11 }
  0x1c   :  { %p357_p0 = pnand %p356_p13, %p350_p10 }
  0x1e   :  { %360 = shalt.err (!%p357_p0)
}
  0x1f   :  { %s368_s1 = smov 64   ;;  %s369_s6 = smov 4  }
  0x20   :  { %45 = dma.hbm_to_vmem [thread:$0]  %s423_s3, 1024, %s40_s29, [#allocation5], %s368_s1, %s368_s1, %s369_s6  }
  0x21   :  { %361 = dma.done.wait [#allocation3], 128  }
  0x22   :  { %362 = vsyncadd [#allocation3], 4294967168 }
  0x23   :  { %363 = dma.done.wait [#allocation5], 1088  }
  0x24   :  { %364 = vsyncadd [#allocation5], 4294966208  ;;  %v370_v0 = vmov 0.0   ;;  %vm371_vm0 = vmmov 0   ;;  %vm72_vm1 = vcmask 1043456   ;;  %v58_v2 = vld [vmem:[#allocation2] sm:$0xff] }
  0x25   :  { %260 = vmatprep.subr.bf16.mxu0 %v370_v0  ;;  %262 = vmatprep.mubr.msk.bf16.mxu0 %vm371_vm0, %v370_v0  ;;  %v60_v1 = vld [vmem:[#allocation4] sm:$0xf]  ;;  %v59_v4 = vpack.c.bf16 %v58_v2, %v58_v2  ;;  %vm68_vm2 = vcmask 64512   ;;  %v294_v6 = vld [vmem:[#allocation6 + $0x30] sm:$0xff]   ;;  %v295_v7 = vld [vmem:[#allocation6 + $0x28] sm:$0xff]   ;;  %vm230_vm3 = vcmask 31744  }
  0x26   :  { %266 = vmatprep.subr.bf16.mxu1 %v370_v0  ;;  %282 = vmatprep.mubr.msk.bf16.mxu1 %vm371_vm0, %v370_v0  ;;  %v74_v3 = vsel %vm72_vm1, %v60_v1, 0  ;;  %v293_v5 = vld [vmem:[#allocation6 + $0x38] sm:$0xff]   ;;  %v296_v8 = vld [vmem:[#allocation6 + $0x20] sm:$0xff]   ;;  %v298_v10 = vld [vmem:[#allocation6 + $0x10] sm:$0xff]  }
  0x27   :  { %261 = vmatpush3.bf16.msra.mxu0 %v74_v3  ;;  %267 = vmatpush3.bf16.msra.mxu1 %v293_v5  ;;  %v297_v9 = vld [vmem:[#allocation6 + $0x18] sm:$0xff]   ;;  %v299_v11 = vld [vmem:[#allocation6 + $0x8] sm:$0xff]   ;;  %v300_v12 = vld [vmem:[#allocation6] sm:$0xff]  }
  0x28   :  { %268 = vmatprep.subr.bf16.mxu1 %v370_v0  ;;  %v238_v13 = vld [vmem:[%s422_s2] ss:$0 sm:$0xff] }
  0x29   :  { %v248_v21 = vld [vmem:[%s424_s4] ss:$0 sm:$0xff] }
  0x2a   :  { %263 = vmatmul.mubr.msk.bf16.vlgmr.msra.gmra.mxu0 %vm68_vm2, %v59_v4 }
  0x2b   :  { %269 = vmatpush3.bf16.msra.mxu1 %v294_v6 }
  0x2c   :  { %270 = vmatprep.subr.bf16.mxu1 %v370_v0 }
  0x2f   :  { %271 = vmatpush3.bf16.msra.mxu1 %v295_v7 }
  0x30   :  { %272 = vmatprep.subr.bf16.mxu1 %v370_v0 }
  0x33   :  { %273 = vmatpush3.bf16.msra.mxu1 %v296_v8 }
  0x34   :  { %274 = vmatprep.subr.bf16.mxu1 %v370_v0 }
  0x37   :  { %275 = vmatpush3.bf16.msra.mxu1 %v297_v9 }
  0x38   :  { %276 = vmatprep.subr.bf16.mxu1 %v370_v0 }
  0x3b   :  { %277 = vmatpush3.bf16.msra.mxu1 %v298_v10 }
  0x3c   :  { %278 = vmatprep.subr.bf16.mxu1 %v370_v0 }
  0x3f   :  { %279 = vmatpush3.bf16.msra.mxu1 %v299_v11 }
  0x40   :  { %280 = vmatprep.subr.bf16.mxu1 %v370_v0 }
  0x43   :  { %281 = vmatpush3.bf16.msra.mxu1 %v300_v12 }
  0xea   :  { %v110_v14 = vpop.f32.mrf.mxu0 }
  0xeb   :  { %v111_v15 = vadd.f32 %v238_v13, %v110_v14 }
  0xec   :  { %v264_v16 = vpop.f32.mrf.mxu0 }
  0xed   :  { %v116_v17 = vmax.f32 %v111_v15, 0.0 }
  0xee   :  { %v113_v18 = vpop.f32.mrf.mxu0 }
  0xef   :  { %v117_v19 = vpack.c.bf16 %v116_v17, %v116_v17 }
  0xf0   :  { %v265_v20 = vpop.f32.mrf.mxu0 }
  0xf1   :  { %283 = vmatmul.mubr.bf16.vlgmr.msra.gmra.mxu1 %v117_v19 }
 0x1b1   :  { %v216_v22 = vpop.f32.mrf.mxu1 }
 0x1b2   :  { %v229_v23 = vadd.f32 %v248_v21, %v216_v22 }
 0x1b3   :  { %v284_v24 = vpop.f32.mrf.mxu1 }
 0x1b4   :  { %231 = vst.msk [vmem:[%s425_s5] sm:$0xff] %vm230_vm3, %v229_v23 }
 0x1b5   :  { %v219_v25 = vpop.f32.mrf.mxu1 }
 0x1b7   :  { %v285_v26 = vpop.f32.mrf.mxu1 }
 0x1b8   :  { %236 = vsyncpa [#allocation3], 1 }
 0x1b9   :  { %237 = vsyncpa [#allocation5], 1 }

</bundles_post_ra>
